<compile_context>
chip_gen: v5e
topology: v5e:2x2
jax: 0.10.0
libtpu: 0.0.40
codegen_flags: <defaults>
</compile_context>

<pallas_src>
import jax
import jax.numpy as jnp
from jax.experimental import pallas as pl
from jax.experimental.pallas import tpu as pltpu


def _round_up(n, m):
    return ((n + m - 1) // m) * m


def generator_kernel(x_ref, r_ref, w1a_ref, w1b_ref, b1_ref,
                     w2_ref, b2_ref, w3_ref, b3_ref, o_ref):
    # Layer 1: Linear(dim_In + dim_Ran -> dim_In*2) + ReLU.
    # Split matmul over the (virtually) concatenated input — no HBM concat.
    h1 = jnp.dot(x_ref[...], w1a_ref[...], preferred_element_type=jnp.float32)
    h1 = h1 + jnp.dot(r_ref[...], w1b_ref[...],
                      preferred_element_type=jnp.float32)
    h1 = jnp.maximum(h1 + b1_ref[...], 0.0)

    # Layer 2: Linear(dim_In*2 -> dim_Hid) + ReLU.
    h2 = jnp.dot(h1, w2_ref[...], preferred_element_type=jnp.float32)
    h2 = jnp.maximum(h2 + b2_ref[...], 0.0)

    # Layer 3: Linear(dim_Hid -> dim_Out) + final ReLU (act='ReLU', mul=1).
    h3 = jnp.dot(h2, w3_ref[...], preferred_element_type=jnp.float32)
    o_ref[...] = jnp.maximum(h3 + b3_ref[...], 0.0).astype(o_ref.dtype)


def prepare_params(params, dim_In):
    """One-time prep (call once, NOT per forward): split W1 rows so x and rand
    feed separate matmuls. Everything stays f32; no padding, no casts."""
    w1, b1, w2, b2, w3, b3 = params
    w1a = jnp.asarray(w1[:dim_In])      # rows consumed by x
    w1b = jnp.asarray(w1[dim_In:])      # rows consumed by rand
    return (w1a, w1b, jnp.asarray(b1), jnp.asarray(w2), jnp.asarray(b2),
            jnp.asarray(w3), jnp.asarray(b3))


def _pick_tile(B):
    # >=4 grid steps once the batch allows it (keeps both v7x TensorCores busy
    # while each core still pipelines); fatter tiles for big batches so the
    # ~0.35us/step overhead stays amortized on v5e/v6e. VMEM is never the
    # constraint at these feature sizes (<1 MiB per step).
    if B >= 2048:
        return 512
    if B >= 512:
        return 128
    return min(128, _round_up(max(B, 1), 8))


def generator_forward(x, rand, prepped, *, tm=None):
    """x: (B, dim_In) f32, rand: (B, dim_Ran) f32. Returns (B, dim_Out) f32."""
    w1a, w1b, b1, w2, b2, w3, b3 = prepped
    B, dim_In = x.shape
    dim_Ran = rand.shape[1]
    H1, H2, Dout = w1a.shape[1], w2.shape[1], w3.shape[1]

    if tm is None:
        tm = _pick_tile(B)
    B_pad = _round_up(B, tm)
    if B_pad != B:
        # Only fires when B % tm != 0; padded rows are sliced off afterwards.
        x = jnp.pad(x, ((0, B_pad - B), (0, 0)))
        rand = jnp.pad(rand, ((0, B_pad - B), (0, 0)))

    grid = (B_pad // tm,)

    flops = 2 * B_pad * ((dim_In + dim_Ran) * H1 + H1 * H2 + H2 * Dout)
    bytes_accessed = 4 * (x.size + rand.size + w1a.size + w1b.size + b1.size
                          + w2.size + b2.size + w3.size + b3.size
                          + B_pad * Dout)

    row_map = lambda i: (i, 0)
    const_map = lambda i: (0, 0)

    out = pl.pallas_call(
        generator_kernel,
        out_shape=jax.ShapeDtypeStruct((B_pad, Dout), jnp.float32),
        grid_spec=pl.GridSpec(
            grid=grid,
            in_specs=[
                pl.BlockSpec((tm, dim_In), row_map),      # x tile
                pl.BlockSpec((tm, dim_Ran), row_map),     # rand tile
                pl.BlockSpec((dim_In, H1), const_map),    # W1a (full array)
                pl.BlockSpec((dim_Ran, H1), const_map),   # W1b (full array)
                pl.BlockSpec((1, H1), const_map),         # b1
                pl.BlockSpec((H1, H2), const_map),        # W2
                pl.BlockSpec((1, H2), const_map),         # b2
                pl.BlockSpec((H2, Dout), const_map),      # W3
                pl.BlockSpec((1, Dout), const_map),       # b3
            ],
            # Output block last dim == full array dim -> no lane padding, no
            # post-kernel slice copy; only real data is written back to HBM.
            out_specs=pl.BlockSpec((tm, Dout), row_map),
        ),
        compiler_params=pltpu.CompilerParams(
            dimension_semantics=("parallel",),
            vmem_limit_bytes=32 * 1024 * 1024,
        ),
        cost_estimate=pl.CostEstimate(
            flops=flops, transcendentals=0, bytes_accessed=bytes_accessed),
    )(x, rand, w1a, w1b, b1, w2, b2, w3, b3)

    if B_pad != B:
        out = out[:B]
    return out


def init_params(key, dim_In, dim_Ran, dim_Hid, dim_Out):
    """Deterministic init matching the layer shapes of the PyTorch module."""
    d_in1 = dim_In + dim_Ran
    d_out1 = dim_In * 2
    ks = jax.random.split(key, 6)

    def lin(kw, kb, fan_in, fan_out):
        bound = 1.0 / jnp.sqrt(fan_in)
        w = jax.random.uniform(kw, (fan_in, fan_out), jnp.float32, -bound, bound)
        b = jax.random.uniform(kb, (1, fan_out), jnp.float32, -bound, bound)
        return w, b

    w1, b1 = lin(ks[0], ks[1], d_in1, d_out1)
    w2, b2 = lin(ks[2], ks[3], d_out1, dim_Hid)
    w3, b3 = lin(ks[4], ks[5], dim_Hid, dim_Out)
    return (w1, b1, w2, b2, w3, b3)


if __name__ == "__main__":
    # Shapes consistent with the module's forward; batch large enough for a
    # 4-step grid with tm=128 (both v7x TCs busy, pipelined on all chips).
    batch = 512
    dim_In, dim_Ran, dim_Hid, dim_Out = 16, 8, 32, 16

    key = jax.random.PRNGKey(0)
    k_x, k_rand, k_p = jax.random.split(key, 3)

    x = jax.random.normal(k_x, (batch, dim_In), jnp.float32)
    # Equivalent of torch.rand(batch, dim_Ran): RNG hoisted out of the kernel,
    # matching the module's host-side torch.rand.
    rand = jax.random.uniform(k_rand, (batch, dim_Ran), jnp.float32)

    params = init_params(k_p, dim_In, dim_Ran, dim_Hid, dim_Out)
    prepped = prepare_params(params, dim_In)   # one-time: split W1, no casts
    # TODO(synk): act='SoftMax' / 'Sigmoid' branches (softmax/sigmoid * 10000)
    # are not exercised; only the default act='ReLU' path is implemented.

    out = generator_forward(x, rand, prepped)
    out = jax.block_until_ready(out)

    # Pure-JAX f32 reference (matches the PyTorch forward structure).
    w1, b1, w2, b2, w3, b3 = params
    hp = jax.lax.Precision.HIGHEST
    xin = jnp.concatenate([x, rand], axis=1)
    h1 = jnp.maximum(jnp.dot(xin, w1, precision=hp) + b1, 0.0)
    h2 = jnp.maximum(jnp.dot(h1, w2, precision=hp) + b2, 0.0)
    ref = jnp.maximum(jnp.dot(h2, w3, precision=hp) + b3, 0.0)

    assert out.shape == (batch, dim_Out)
    assert jnp.allclose(out, ref, atol=5e-3, rtol=5e-3), float(
        jnp.max(jnp.abs(out - ref)))

    print("KERNEL_OK")
</pallas_src>

<mosaic_0001>
module attributes {stable_mosaic.version = 11 : i64} {
  func.func @generator_kernel(%arg0: i32, %arg1: memref<128x16xf32, #tpu.memory_space<vmem>>, %arg2: memref<128x8xf32, #tpu.memory_space<vmem>>, %arg3: memref<16x32xf32, #tpu.memory_space<vmem>>, %arg4: memref<8x32xf32, #tpu.memory_space<vmem>>, %arg5: memref<1x32xf32, #tpu.memory_space<vmem>>, %arg6: memref<32x32xf32, #tpu.memory_space<vmem>>, %arg7: memref<1x32xf32, #tpu.memory_space<vmem>>, %arg8: memref<32x16xf32, #tpu.memory_space<vmem>>, %arg9: memref<1x16xf32, #tpu.memory_space<vmem>>, %arg10: memref<128x16xf32, #tpu.memory_space<vmem>>) attributes {dimension_semantics = [#tpu.dimension_semantics<parallel>], iteration_bounds = array<i64: 4>, scalar_prefetch = 0 : i64, scratch_operands = 0 : i64, tpu.core_type = #tpu.core_type<tc>, window_params = [{transform_indices = @transform_0, window_bounds = array<i64: 128, 16>}, {transform_indices = @transform_1, window_bounds = array<i64: 128, 8>}, {pipeline_mode = #tpu.pipeline_mode<synchronous>, transform_indices = @transform_2, window_bounds = array<i64: 16, 32>}, {pipeline_mode = #tpu.pipeline_mode<synchronous>, transform_indices = @transform_3, window_bounds = array<i64: 8, 32>}, {pipeline_mode = #tpu.pipeline_mode<synchronous>, transform_indices = @transform_4, window_bounds = array<i64: 1, 32>}, {pipeline_mode = #tpu.pipeline_mode<synchronous>, transform_indices = @transform_5, window_bounds = array<i64: 32, 32>}, {pipeline_mode = #tpu.pipeline_mode<synchronous>, transform_indices = @transform_6, window_bounds = array<i64: 1, 32>}, {pipeline_mode = #tpu.pipeline_mode<synchronous>, transform_indices = @transform_7, window_bounds = array<i64: 32, 16>}, {pipeline_mode = #tpu.pipeline_mode<synchronous>, transform_indices = @transform_8, window_bounds = array<i64: 1, 16>}, {transform_indices = @transform_9, window_bounds = array<i64: 128, 16>}]} {
    %c0 = arith.constant 0 : index
    %c0_0 = arith.constant 0 : index
    %0 = vector.load %arg1[%c0, %c0_0] : memref<128x16xf32, #tpu.memory_space<vmem>>, vector<128x16xf32>
    %c0_1 = arith.constant 0 : index
    %c0_2 = arith.constant 0 : index
    %1 = vector.load %arg3[%c0_1, %c0_2] : memref<16x32xf32, #tpu.memory_space<vmem>>, vector<16x32xf32>
    %cst = arith.constant dense<0.000000e+00> : vector<128x32xf32>
    %2 = tpu.matmul %0, %1, %cst {dimension_numbers = #tpu.dot_dimension_numbers<[1], [0], [0], [1], [0, 0, 1, 1], [], []>} : vector<128x16xf32>, vector<16x32xf32>, vector<128x32xf32> -> vector<128x32xf32>
    %c0_3 = arith.constant 0 : index
    %c0_4 = arith.constant 0 : index
    %3 = vector.load %arg2[%c0_3, %c0_4] : memref<128x8xf32, #tpu.memory_space<vmem>>, vector<128x8xf32>
    %c0_5 = arith.constant 0 : index
    %c0_6 = arith.constant 0 : index
    %4 = vector.load %arg4[%c0_5, %c0_6] : memref<8x32xf32, #tpu.memory_space<vmem>>, vector<8x32xf32>
    %cst_7 = arith.constant dense<0.000000e+00> : vector<128x32xf32>
    %5 = tpu.matmul %3, %4, %cst_7 {dimension_numbers = #tpu.dot_dimension_numbers<[1], [0], [0], [1], [0, 0, 1, 1], [], []>} : vector<128x8xf32>, vector<8x32xf32>, vector<128x32xf32> -> vector<128x32xf32>
    %6 = arith.addf %2, %5 : vector<128x32xf32>
    %c0_8 = arith.constant 0 : index
    %c0_9 = arith.constant 0 : index
    %7 = vector.load %arg5[%c0_8, %c0_9] : memref<1x32xf32, #tpu.memory_space<vmem>>, vector<1x32xf32>
    %8 = vector.broadcast %7 : vector<1x32xf32> to vector<128x32xf32>
    %9 = arith.addf %6, %8 : vector<128x32xf32>
    %cst_10 = arith.constant 0.000000e+00 : f32
    %10 = vector.broadcast %cst_10 : f32 to vector<128x32xf32>
    %11 = arith.maximumf %9, %10 : vector<128x32xf32>
    %c0_11 = arith.constant 0 : index
    %c0_12 = arith.constant 0 : index
    %12 = vector.load %arg6[%c0_11, %c0_12] : memref<32x32xf32, #tpu.memory_space<vmem>>, vector<32x32xf32>
    %cst_13 = arith.constant dense<0.000000e+00> : vector<128x32xf32>
    %13 = tpu.matmul %11, %12, %cst_13 {dimension_numbers = #tpu.dot_dimension_numbers<[1], [0], [0], [1], [0, 0, 1, 1], [], []>} : vector<128x32xf32>, vector<32x32xf32>, vector<128x32xf32> -> vector<128x32xf32>
    %c0_14 = arith.constant 0 : index
    %c0_15 = arith.constant 0 : index
    %14 = vector.load %arg7[%c0_14, %c0_15] : memref<1x32xf32, #tpu.memory_space<vmem>>, vector<1x32xf32>
    %15 = vector.broadcast %14 : vector<1x32xf32> to vector<128x32xf32>
    %16 = arith.addf %13, %15 : vector<128x32xf32>
    %cst_16 = arith.constant 0.000000e+00 : f32
    %17 = vector.broadcast %cst_16 : f32 to vector<128x32xf32>
    %18 = arith.maximumf %16, %17 : vector<128x32xf32>
    %c0_17 = arith.constant 0 : index
    %c0_18 = arith.constant 0 : index
    %19 = vector.load %arg8[%c0_17, %c0_18] : memref<32x16xf32, #tpu.memory_space<vmem>>, vector<32x16xf32>
    %cst_19 = arith.constant dense<0.000000e+00> : vector<128x16xf32>
    %20 = tpu.matmul %18, %19, %cst_19 {dimension_numbers = #tpu.dot_dimension_numbers<[1], [0], [0], [1], [0, 0, 1, 1], [], []>} : vector<128x32xf32>, vector<32x16xf32>, vector<128x16xf32> -> vector<128x16xf32>
    %c0_20 = arith.constant 0 : index
    %c0_21 = arith.constant 0 : index
    %21 = vector.load %arg9[%c0_20, %c0_21] : memref<1x16xf32, #tpu.memory_space<vmem>>, vector<1x16xf32>
    %22 = vector.broadcast %21 : vector<1x16xf32> to vector<128x16xf32>
    %23 = arith.addf %20, %22 : vector<128x16xf32>
    %cst_22 = arith.constant 0.000000e+00 : f32
    %24 = vector.broadcast %cst_22 : f32 to vector<128x16xf32>
    %25 = arith.maximumf %23, %24 : vector<128x16xf32>
    %c0_23 = arith.constant 0 : index
    %c0_24 = arith.constant 0 : index
    %26 = vector.load %arg10[%c0_23, %c0_24] : memref<128x16xf32, #tpu.memory_space<vmem>>, vector<128x16xf32>
    tpu.vector_store %arg10[%c0_23, %c0_24], %25 {strides = array<i32>} : memref<128x16xf32, #tpu.memory_space<vmem>>, vector<128x16xf32>,
    return
  }
  func.func @transform_0(%arg0: i32) -> (i32, i32) {
    %c0_i32 = arith.constant 0 : i32
    %c0_i32_0 = arith.constant 0 : i32
    return %arg0, %c0_i32 : i32, i32
  }
  func.func @transform_1(%arg0: i32) -> (i32, i32) {
    %c0_i32 = arith.constant 0 : i32
    %c0_i32_0 = arith.constant 0 : i32
    return %arg0, %c0_i32 : i32, i32
  }
  func.func @transform_2(%arg0: i32) -> (i32, i32) {
    %c0_i32 = arith.constant 0 : i32
    %c0_i32_0 = arith.constant 0 : i32
    %c0_i32_1 = arith.constant 0 : i32
    return %c0_i32, %c0_i32_0 : i32, i32
  }
  func.func @transform_3(%arg0: i32) -> (i32, i32) {
    %c0_i32 = arith.constant 0 : i32
    %c0_i32_0 = arith.constant 0 : i32
    %c0_i32_1 = arith.constant 0 : i32
    return %c0_i32, %c0_i32_0 : i32, i32
  }
  func.func @transform_4(%arg0: i32) -> (i32, i32) {
    %c0_i32 = arith.constant 0 : i32
    %c0_i32_0 = arith.constant 0 : i32
    %c0_i32_1 = arith.constant 0 : i32
    return %c0_i32, %c0_i32_0 : i32, i32
  }
  func.func @transform_5(%arg0: i32) -> (i32, i32) {
    %c0_i32 = arith.constant 0 : i32
    %c0_i32_0 = arith.constant 0 : i32
    %c0_i32_1 = arith.constant 0 : i32
    return %c0_i32, %c0_i32_0 : i32, i32
  }
  func.func @transform_6(%arg0: i32) -> (i32, i32) {
    %c0_i32 = arith.constant 0 : i32
    %c0_i32_0 = arith.constant 0 : i32
    %c0_i32_1 = arith.constant 0 : i32
    return %c0_i32, %c0_i32_0 : i32, i32
  }
  func.func @transform_7(%arg0: i32) -> (i32, i32) {
    %c0_i32 = arith.constant 0 : i32
    %c0_i32_0 = arith.constant 0 : i32
    %c0_i32_1 = arith.constant 0 : i32
    return %c0_i32, %c0_i32_0 : i32, i32
  }
  func.func @transform_8(%arg0: i32) -> (i32, i32) {
    %c0_i32 = arith.constant 0 : i32
    %c0_i32_0 = arith.constant 0 : i32
    %c0_i32_1 = arith.constant 0 : i32
    return %c0_i32, %c0_i32_0 : i32, i32
  }
  func.func @transform_9(%arg0: i32) -> (i32, i32) {
    %c0_i32 = arith.constant 0 : i32
    %c0_i32_0 = arith.constant 0 : i32
    return %arg0, %c0_i32 : i32, i32
  }
}

</mosaic_0001>

<bundles_post_ra>
// kernel: tpu_custom_call.1
= control target key start
LH: loop header
LB: loop body
LE: loop exit
PB: predicated region body
PF: predicated region fallthrough
CT: control target
= control target key end

     0   :  { %s1162_s30 = smov 0   ;;  %s1399_s0 = inlined_call_operand.vmem [shape: f32[512,16], index: 0, kind: input, shape index: {}]   ;;  %s1400_s1 = inlined_call_operand.vmem [shape: f32[512,8], index: 1, kind: input, shape index: {}]   ;;  %s1401_s2 = inlined_call_operand.vmem [shape: f32[16,32], index: 2, kind: input, shape index: {}]   ;;  %s1402_s3 = inlined_call_operand.vmem [shape: f32[8,32], index: 3, kind: input, shape index: {}]   ;;  %s1403_s4 = inlined_call_operand.vmem [shape: f32[1,32], index: 4, kind: input, shape index: {}]   ;;  %s1404_s5 = inlined_call_operand.vmem [shape: f32[32,32], index: 5, kind: input, shape index: {}]   ;;  %s1405_s6 = inlined_call_operand.vmem [shape: f32[1,32], index: 6, kind: input, shape index: {}]   ;;  %s1406_s7 = inlined_call_operand.vmem [shape: f32[32,16], index: 7, kind: input, shape index: {}]   ;;  %s1407_s8 = inlined_call_operand.vmem [shape: f32[1,16], index: 8, kind: input, shape index: {}]   ;;  %s1408_s9 = inlined_call_operand.vmem [shape: f32[512,16], index: 9, kind: output, shape index: {}]  }
   0x1 LB: > { %s1016_s10 = sadd.s32 4294967295, %s1110_s30   ;;  %p1020_p0 = scmp.ge.s32.totalorder %s1110_s30, 1  ;;  %s1110_s30 = sphi %s1162_s30, %s19_s30  }
   0x2   : > { %p299_p1 = scmp.lt.s32.totalorder %s1110_s30, 5 }
   0x4   : > { %p300_p2 = pnand %p1020_p0, %p299_p1 }
   0x5   : > { %s1021_s17 = sshll.u32 (!%p300_p2), %s1016_s10, 4 }
   0x6   : > { %303 = sbr.rel (%p300_p2) target bundleno = 541 (0x21d), region = 56  ;;  %p341_p3 = scmp.lt.s32.totalorder (!%p300_p2), %s1021_s17, 63 }
   0xb   : > { %v375_v0 = vld [vmem:[%s1401_s2 + $0x8] sm:$0xff]  ;;  %v392_v1 = vld [vmem:[%s1402_s3] sm:$0xff]  ;;  %s1410_s17 = smov (!%p341_p3, %s1021_s17), 63  ;;  %vm393_vm0 = vcmask 64512   ;;  %vm507_vm1 = vcmask 130048   ;;  %v660_v27 = vld [vmem:[%s1404_s5 + $0x18] sm:$0xff] }
   0xc   : > { %v374_v2 = vld [vmem:[%s1401_s2] sm:$0xff]  ;;  %570 = vmatpush.msra.mxu1 %v375_v0  ;;  %457 = vmatpush.msra.mxu0 %v392_v1  ;;  %s1179_s18 = sshll.u32 %s1410_s17, 3  ;;  %v659_v30 = vld [vmem:[%s1404_s5 + $0x10] sm:$0xff]  ;;  %v658_v31 = vld [vmem:[%s1404_s5 + $0x8] sm:$0xff]  ;;  %vm665_vm2 = vcmask 261120  }
   0xd   : > { %s1185_s21 = scalar_lea.vmem %s1400_s1, %s1179_s18  ;;  %s1191_s24 = scalar_lea.vmem %s1399_s0, %s1179_s18  ;;  %726 = vmatpush.msra.mxu2 %v660_v27  ;;  %v657_v32 = vld [vmem:[%s1404_s5] sm:$0xff] }
   0xe   : > { %571 = vmatpush.msra.mxu1 %v374_v2  ;;  %v376_v3 = vld [vmem:[%s1185_s21] sm:$0xff]  ;;  %v377_v5 = vld [vmem:[%s1185_s21 + $0x8] sm:$0xff]  ;;  %v378_v7 = vld [vmem:[%s1185_s21 + $0x10] sm:$0xff]  ;;  %s1347_s10 = scalar_lea.vmem %s1408_s9, %s1179_s18 }
   0xf   : > { %v358_v4 = vld [vmem:[%s1191_s24] sm:$0xff]  ;;  %1027 = vmatmul.msk.f32.vlgmr.msra.gmra.mxu0 %vm393_vm0, %v376_v3  ;;  %v359_v6 = vld [vmem:[%s1191_s24 + $0x8] sm:$0xff]  ;;  %v360_v8 = vld [vmem:[%s1191_s24 + $0x10] sm:$0xff]  ;;  %727 = vmatpush.msra.mxu2 %v659_v30 }
  0x10   : > { %1043 = vmatmul.msk.f32.vlgmr.msra.gmra.mxu1 %vm507_vm1, %v358_v4  ;;  %v379_v9 = vld [vmem:[%s1185_s21 + $0x18] sm:$0xff]  ;;  %v380_v11 = vld [vmem:[%s1185_s21 + $0x20] sm:$0xff]  ;;  %v381_v13 = vld [vmem:[%s1185_s21 + $0x28] sm:$0xff] }
  0x11   : > { %v361_v10 = vld [vmem:[%s1191_s24 + $0x18] sm:$0xff]  ;;  %v362_v12 = vld [vmem:[%s1191_s24 + $0x20] sm:$0xff]  ;;  %v363_v14 = vld [vmem:[%s1191_s24 + $0x28] sm:$0xff]  ;;  %728 = vmatpush.msra.mxu2 %v658_v31 }
  0x12   : > { %v382_v15 = vld [vmem:[%s1185_s21 + $0x30] sm:$0xff]  ;;  %v383_v17 = vld [vmem:[%s1185_s21 + $0x38] sm:$0xff]  ;;  %v384_v19 = vld [vmem:[%s1185_s21 + $0x40] sm:$0xff] }
  0x13   : > { %v364_v16 = vld [vmem:[%s1191_s24 + $0x30] sm:$0xff]  ;;  %v365_v18 = vld [vmem:[%s1191_s24 + $0x38] sm:$0xff]  ;;  %v366_v20 = vld [vmem:[%s1191_s24 + $0x40] sm:$0xff]  ;;  %729 = vmatpush.msra.mxu2 %v657_v32 }
  0x14   : > { %v385_v21 = vld [vmem:[%s1185_s21 + $0x48] sm:$0xff]  ;;  %v386_v23 = vld [vmem:[%s1185_s21 + $0x50] sm:$0xff]  ;;  %v387_v25 = vld [vmem:[%s1185_s21 + $0x58] sm:$0xff] }
  0x15   : > { %v367_v22 = vld [vmem:[%s1191_s24 + $0x48] sm:$0xff]  ;;  %v368_v24 = vld [vmem:[%s1191_s24 + $0x50] sm:$0xff]  ;;  %v369_v26 = vld [vmem:[%s1191_s24 + $0x58] sm:$0xff] }
  0x16   : > { %v388_v28 = vld [vmem:[%s1185_s21 + $0x60] sm:$0xff]  ;;  %v389_v33 = vld [vmem:[%s1185_s21 + $0x68] sm:$0xff]  ;;  %v390_v35 = vld [vmem:[%s1185_s21 + $0x70] sm:$0xff] }
  0x17   : > { %1028 = vmatmul.msk.f32.gmra.mxu0 %vm393_vm0, %v377_v5  ;;  %v370_v29 = vld [vmem:[%s1191_s24 + $0x60] sm:$0xff]  ;;  %v371_v34 = vld [vmem:[%s1191_s24 + $0x68] sm:$0xff]  ;;  %v372_v36 = vld [vmem:[%s1191_s24 + $0x70] sm:$0xff] }
  0x18   : > { %1044 = vmatmul.msk.f32.gmra.mxu1 %vm507_vm1, %v359_v6  ;;  %v391_v37 = vld [vmem:[%s1185_s21 + $0x78] sm:$0xff]  ;;  %v1272_v39 = vld [vmem:[%s1403_s4] ss:$0 sm:$0xff] }
  0x19   : > { %v373_v38 = vld [vmem:[%s1191_s24 + $0x78] sm:$0xff] }
  0x1f   : > { %1029 = vmatmul.msk.f32.gmra.mxu0 %vm393_vm0, %v378_v7 }
  0x20   : > { %1045 = vmatmul.msk.f32.gmra.mxu1 %vm507_vm1, %v360_v8 }
  0x27   : > { %1030 = vmatmul.msk.f32.gmra.mxu0 %vm393_vm0, %v379_v9 }
  0x28   : > { %1046 = vmatmul.msk.f32.gmra.mxu1 %vm507_vm1, %v361_v10 }
  0x2f   : > { %1031 = vmatmul.msk.f32.gmra.mxu0 %vm393_vm0, %v380_v11 }
  0x30   : > { %1047 = vmatmul.msk.f32.gmra.mxu1 %vm507_vm1, %v362_v12 }
  0x37   : > { %1032 = vmatmul.msk.f32.gmra.mxu0 %vm393_vm0, %v381_v13 }
  0x38   : > { %1048 = vmatmul.msk.f32.gmra.mxu1 %vm507_vm1, %v363_v14 }
  0x3f   : > { %1033 = vmatmul.msk.f32.gmra.mxu0 %vm393_vm0, %v382_v15 }
  0x40   : > { %1049 = vmatmul.msk.f32.gmra.mxu1 %vm507_vm1, %v364_v16 }
  0x47   : > { %1034 = vmatmul.msk.f32.gmra.mxu0 %vm393_vm0, %v383_v17 }
  0x48   : > { %1050 = vmatmul.msk.f32.gmra.mxu1 %vm507_vm1, %v365_v18 }
  0x4f   : > { %1035 = vmatmul.msk.f32.gmra.mxu0 %vm393_vm0, %v384_v19 }
  0x50   : > { %1051 = vmatmul.msk.f32.gmra.mxu1 %vm507_vm1, %v366_v20 }
  0x57   : > { %1036 = vmatmul.msk.f32.gmra.mxu0 %vm393_vm0, %v385_v21 }
  0x58   : > { %1052 = vmatmul.msk.f32.gmra.mxu1 %vm507_vm1, %v367_v22 }
  0x5f   : > { %1037 = vmatmul.msk.f32.gmra.mxu0 %vm393_vm0, %v386_v23 }
  0x60   : > { %1053 = vmatmul.msk.f32.gmra.mxu1 %vm507_vm1, %v368_v24 }
  0x67   : > { %1038 = vmatmul.msk.f32.gmra.mxu0 %vm393_vm0, %v387_v25 }
  0x68   : > { %1054 = vmatmul.msk.f32.gmra.mxu1 %vm507_vm1, %v369_v26 }
  0x6f   : > { %1039 = vmatmul.msk.f32.gmra.mxu0 %vm393_vm0, %v388_v28 }
  0x70   : > { %1055 = vmatmul.msk.f32.gmra.mxu1 %vm507_vm1, %v370_v29 }
  0x77   : > { %1040 = vmatmul.msk.f32.gmra.mxu0 %vm393_vm0, %v389_v33 }
  0x78   : > { %1056 = vmatmul.msk.f32.gmra.mxu1 %vm507_vm1, %v371_v34 }
  0x7f   : > { %1041 = vmatmul.msk.f32.gmra.mxu0 %vm393_vm0, %v390_v35 }
  0x80   : > { %1057 = vmatmul.msk.f32.gmra.mxu1 %vm507_vm1, %v372_v36  ;;  %v798_v36 = vld [vmem:[%s1406_s7 + $0x18] sm:$0xff] }
  0x81   : > { %863 = vmatpush.msra.mxu3 %v798_v36 }
  0x87   : > { %1042 = vmatmul.msk.f32.gmra.mxu0 %vm393_vm0, %v391_v37 }
  0x88   : > { %1058 = vmatmul.msk.f32.gmra.mxu1 %vm507_vm1, %v373_v38 }
  0x8c   : > { %v459_v40 = vpop.f32.mrf.mxu0 }
  0x8d   : > { %v573_v41 = vpop.f32.mrf.mxu1 }
  0x8e   : > { %v574_v42 = vadd.f32 %v573_v41, %v459_v40 }
  0x90   : > { %v625_v43 = vadd.f32 %v1272_v39, %v574_v42 }
  0x92   : > { %v641_v44 = vmax.f32 %v625_v43, 0.0 }
  0x94   : > { %1059 = vmatmul.msk.f32.vlgmr.msra.gmra.mxu2 %vm665_vm2, %v641_v44  ;;  %v462_v45 = vpop.f32.mrf.mxu0 }
  0x95   : > { %v576_v46 = vpop.f32.mrf.mxu1 }
  0x96   : > { %v577_v47 = vadd.f32 %v576_v46, %v462_v45  ;;  %v797_v46 = vld [vmem:[%s1406_s7 + $0x10] sm:$0xff] }
  0x97   : > { %864 = vmatpush.msra.mxu3 %v797_v46  ;;  %v1340_v46 = vld [vmem:[%s1407_s8] ss:$0 sm:$0xff] }
  0x98   : > { %v626_v48 = vadd.f32 %v1272_v39, %v577_v47 }
  0x9a   : > { %v642_v49 = vmax.f32 %v626_v48, 0.0  ;;  %v796_v48 = vld [vmem:[%s1406_s7 + $0x8] sm:$0xff] }
  0x9b   : > { %865 = vmatpush.msra.mxu3 %v796_v48 }
  0x9c   : > { %1060 = vmatmul.msk.f32.gmra.mxu2 %vm665_vm2, %v642_v49  ;;  %v465_v50 = vpop.f32.mrf.mxu0 }
  0x9d   : > { %v579_v51 = vpop.f32.mrf.mxu1 }
  0x9e   : > { %v580_v52 = vadd.f32 %v579_v51, %v465_v50  ;;  %v795_v50 = vld [vmem:[%s1406_s7] sm:$0xff] }
  0x9f   : > { %866 = vmatpush.msra.mxu3 %v795_v50 }
  0xa0   : > { %v627_v53 = vadd.f32 %v1272_v39, %v580_v52 }
  0xa2   : > { %v643_v54 = vmax.f32 %v627_v53, 0.0 }
  0xa4   : > { %1061 = vmatmul.msk.f32.gmra.mxu2 %vm665_vm2, %v643_v54  ;;  %v468_v55 = vpop.f32.mrf.mxu0 }
  0xa5   : > { %v582_v56 = vpop.f32.mrf.mxu1 }
  0xa6   : > { %v583_v57 = vadd.f32 %v582_v56, %v468_v55 }
  0xa8   : > { %v628_v58 = vadd.f32 %v1272_v39, %v583_v57 }
  0xaa   : > { %v644_v59 = vmax.f32 %v628_v58, 0.0 }
  0xac   : > { %1062 = vmatmul.msk.f32.gmra.mxu2 %vm665_vm2, %v644_v59  ;;  %v471_v60 = vpop.f32.mrf.mxu0 }
  0xad   : > { %v585_v61 = vpop.f32.mrf.mxu1 }
  0xae   : > { %v586_v62 = vadd.f32 %v585_v61, %v471_v60  ;;  %v1102_v61 = vld [vmem:[%s1405_s6] ss:$0 sm:$0xff] }
  0xb0   : > { %v629_v63 = vadd.f32 %v1272_v39, %v586_v62 }
  0xb2   : > { %v645_v0 = vmax.f32 %v629_v63, 0.0 }
  0xb4   : > { %1063 = vmatmul.msk.f32.gmra.mxu2 %vm665_vm2, %v645_v0  ;;  %v474_v1 = vpop.f32.mrf.mxu0 }
  0xb5   : > { %v588_v2 = vpop.f32.mrf.mxu1 }
  0xb6   : > { %v589_v3 = vadd.f32 %v588_v2, %v474_v1 }
  0xb8   : > { %v630_v4 = vadd.f32 %v1272_v39, %v589_v3 }
  0xba   : > { %v646_v5 = vmax.f32 %v630_v4, 0.0 }
  0xbc   : > { %1064 = vmatmul.msk.f32.gmra.mxu2 %vm665_vm2, %v646_v5  ;;  %v477_v6 = vpop.f32.mrf.mxu0 }
  0xbd   : > { %v591_v7 = vpop.f32.mrf.mxu1 }
  0xbe   : > { %v592_v8 = vadd.f32 %v591_v7, %v477_v6 }
  0xc0   : > { %v631_v9 = vadd.f32 %v1272_v39, %v592_v8 }
  0xc2   : > { %v647_v10 = vmax.f32 %v631_v9, 0.0 }
  0xc4   : > { %1065 = vmatmul.msk.f32.gmra.mxu2 %vm665_vm2, %v647_v10  ;;  %v480_v11 = vpop.f32.mrf.mxu0 }
  0xc5   : > { %v594_v12 = vpop.f32.mrf.mxu1 }
  0xc6   : > { %v595_v13 = vadd.f32 %v594_v12, %v480_v11 }
  0xc8   : > { %v632_v14 = vadd.f32 %v1272_v39, %v595_v13 }
  0xca   : > { %v648_v15 = vmax.f32 %v632_v14, 0.0 }
  0xcc   : > { %1066 = vmatmul.msk.f32.gmra.mxu2 %vm665_vm2, %v648_v15  ;;  %v483_v16 = vpop.f32.mrf.mxu0 }
  0xcd   : > { %v597_v17 = vpop.f32.mrf.mxu1 }
  0xce   : > { %v598_v18 = vadd.f32 %v597_v17, %v483_v16 }
  0xd0   : > { %v633_v19 = vadd.f32 %v1272_v39, %v598_v18 }
  0xd2   : > { %v649_v20 = vmax.f32 %v633_v19, 0.0 }
  0xd4   : > { %1067 = vmatmul.msk.f32.gmra.mxu2 %vm665_vm2, %v649_v20  ;;  %v486_v21 = vpop.f32.mrf.mxu0 }
  0xd5   : > { %v600_v22 = vpop.f32.mrf.mxu1 }
  0xd6   : > { %v601_v23 = vadd.f32 %v600_v22, %v486_v21 }
  0xd8   : > { %v634_v24 = vadd.f32 %v1272_v39, %v601_v23 }
  0xda   : > { %v650_v25 = vmax.f32 %v634_v24, 0.0 }
  0xdc   : > { %1068 = vmatmul.msk.f32.gmra.mxu2 %vm665_vm2, %v650_v25  ;;  %v489_v26 = vpop.f32.mrf.mxu0 }
  0xdd   : > { %v603_v27 = vpop.f32.mrf.mxu1 }
  0xde   : > { %v604_v28 = vadd.f32 %v603_v27, %v489_v26 }
  0xe0   : > { %v635_v29 = vadd.f32 %v1272_v39, %v604_v28 }
  0xe2   : > { %v651_v30 = vmax.f32 %v635_v29, 0.0 }
  0xe4   : > { %1069 = vmatmul.msk.f32.gmra.mxu2 %vm665_vm2, %v651_v30  ;;  %v492_v31 = vpop.f32.mrf.mxu0 }
  0xe5   : > { %v606_v32 = vpop.f32.mrf.mxu1 }
  0xe6   : > { %v607_v33 = vadd.f32 %v606_v32, %v492_v31 }
  0xe8   : > { %v636_v34 = vadd.f32 %v1272_v39, %v607_v33 }
  0xea   : > { %v652_v35 = vmax.f32 %v636_v34, 0.0 }
  0xec   : > { %1070 = vmatmul.msk.f32.gmra.mxu2 %vm665_vm2, %v652_v35  ;;  %v495_v37 = vpop.f32.mrf.mxu0 }
  0xed   : > { %v609_v38 = vpop.f32.mrf.mxu1 }
  0xee   : > { %v610_v40 = vadd.f32 %v609_v38, %v495_v37 }
  0xf0   : > { %v637_v41 = vadd.f32 %v1272_v39, %v610_v40 }
  0xf2   : > { %v653_v42 = vmax.f32 %v637_v41, 0.0 }
  0xf4   : > { %1071 = vmatmul.msk.f32.gmra.mxu2 %vm665_vm2, %v653_v42  ;;  %v498_v43 = vpop.f32.mrf.mxu0 }
  0xf5   : > { %v612_v44 = vpop.f32.mrf.mxu1 }
  0xf6   : > { %v613_v45 = vadd.f32 %v612_v44, %v498_v43 }
  0xf8   : > { %v638_v47 = vadd.f32 %v1272_v39, %v613_v45 }
  0xfa   : > { %v654_v49 = vmax.f32 %v638_v47, 0.0 }
  0xfc   : > { %1072 = vmatmul.msk.f32.gmra.mxu2 %vm665_vm2, %v654_v49  ;;  %v501_v51 = vpop.f32.mrf.mxu0 }
  0xfd   : > { %v615_v52 = vpop.f32.mrf.mxu1 }
  0xfe   : > { %v616_v53 = vadd.f32 %v615_v52, %v501_v51 }
 0x100   : > { %v639_v54 = vadd.f32 %v1272_v39, %v616_v53 }
 0x102   : > { %v655_v55 = vmax.f32 %v639_v54, 0.0 }
 0x104   : > { %1073 = vmatmul.msk.f32.gmra.mxu2 %vm665_vm2, %v655_v55  ;;  %v504_v56 = vpop.f32.mrf.mxu0 }
 0x105   : > { %v618_v57 = vpop.f32.mrf.mxu1 }
 0x106   : > { %v619_v58 = vadd.f32 %v618_v57, %v504_v56 }
 0x108   : > { %v640_v59 = vadd.f32 %v1272_v39, %v619_v58 }
 0x10a   : > { %v656_v60 = vmax.f32 %v640_v59, 0.0 }
 0x10c   : > { %1074 = vmatmul.msk.f32.gmra.mxu2 %vm665_vm2, %v656_v60 }
 0x117   : > { %v731_v62 = vpop.f32.mrf.mxu2 }
 0x118   : > { %v732_v63 = vadd.f32 %v1102_v61, %v731_v62 }
 0x11a   : > { %v779_v0 = vmax.f32 %v732_v63, 0.0 }
 0x11c   : > { %1075 = vmatmul.msk.f32.vlgmr.msra.gmra.mxu3 %vm665_vm2, %v779_v0 }
 0x11f   : > { %v734_v1 = vpop.f32.mrf.mxu2 }
 0x120   : > { %v735_v2 = vadd.f32 %v1102_v61, %v734_v1 }
 0x122   : > { %v780_v3 = vmax.f32 %v735_v2, 0.0 }
 0x124   : > { %1076 = vmatmul.msk.f32.gmra.mxu3 %vm665_vm2, %v780_v3 }
 0x127   : > { %v737_v4 = vpop.f32.mrf.mxu2 }
 0x128   : > { %v738_v5 = vadd.f32 %v1102_v61, %v737_v4 }
 0x12a   : > { %v781_v39 = vmax.f32 %v738_v5, 0.0 }
 0x12c   : > { %1077 = vmatmul.msk.f32.gmra.mxu3 %vm665_vm2, %v781_v39 }
 0x12f   : > { %v740_v6 = vpop.f32.mrf.mxu2 }
 0x130   : > { %v741_v7 = vadd.f32 %v1102_v61, %v740_v6 }
 0x132   : > { %v782_v8 = vmax.f32 %v741_v7, 0.0 }
 0x134   : > { %1078 = vmatmul.msk.f32.gmra.mxu3 %vm665_vm2, %v782_v8 }
 0x137   : > { %v743_v9 = vpop.f32.mrf.mxu2 }
 0x138   : > { %v744_v10 = vadd.f32 %v1102_v61, %v743_v9 }
 0x13a   : > { %v783_v11 = vmax.f32 %v744_v10, 0.0 }
 0x13c   : > { %1079 = vmatmul.msk.f32.gmra.mxu3 %vm665_vm2, %v783_v11 }
 0x13f   : > { %v746_v12 = vpop.f32.mrf.mxu2 }
 0x140   : > { %v747_v13 = vadd.f32 %v1102_v61, %v746_v12 }
 0x142   : > { %v784_v14 = vmax.f32 %v747_v13, 0.0 }
 0x144   : > { %1080 = vmatmul.msk.f32.gmra.mxu3 %vm665_vm2, %v784_v14 }
 0x147   : > { %v749_v15 = vpop.f32.mrf.mxu2 }
 0x148   : > { %v750_v16 = vadd.f32 %v1102_v61, %v749_v15 }
 0x14a   : > { %v785_v17 = vmax.f32 %v750_v16, 0.0 }
 0x14c   : > { %1081 = vmatmul.msk.f32.gmra.mxu3 %vm665_vm2, %v785_v17 }
 0x14f   : > { %v752_v18 = vpop.f32.mrf.mxu2 }
 0x150   : > { %v753_v19 = vadd.f32 %v1102_v61, %v752_v18 }
 0x152   : > { %v786_v20 = vmax.f32 %v753_v19, 0.0 }
 0x154   : > { %1082 = vmatmul.msk.f32.gmra.mxu3 %vm665_vm2, %v786_v20 }
 0x157   : > { %v755_v21 = vpop.f32.mrf.mxu2 }
 0x158   : > { %v756_v22 = vadd.f32 %v1102_v61, %v755_v21 }
 0x15a   : > { %v787_v23 = vmax.f32 %v756_v22, 0.0 }
 0x15c   : > { %1083 = vmatmul.msk.f32.gmra.mxu3 %vm665_vm2, %v787_v23 }
 0x15f   : > { %v758_v24 = vpop.f32.mrf.mxu2 }
 0x160   : > { %v759_v25 = vadd.f32 %v1102_v61, %v758_v24 }
 0x162   : > { %v788_v26 = vmax.f32 %v759_v25, 0.0 }
 0x164   : > { %1084 = vmatmul.msk.f32.gmra.mxu3 %vm665_vm2, %v788_v26 }
 0x167   : > { %v761_v27 = vpop.f32.mrf.mxu2 }
 0x168   : > { %v762_v28 = vadd.f32 %v1102_v61, %v761_v27 }
 0x16a   : > { %v789_v29 = vmax.f32 %v762_v28, 0.0 }
 0x16c   : > { %1085 = vmatmul.msk.f32.gmra.mxu3 %vm665_vm2, %v789_v29 }
 0x16f   : > { %v764_v30 = vpop.f32.mrf.mxu2 }
 0x170   : > { %v765_v31 = vadd.f32 %v1102_v61, %v764_v30 }
 0x172   : > { %v790_v32 = vmax.f32 %v765_v31, 0.0 }
 0x174   : > { %1086 = vmatmul.msk.f32.gmra.mxu3 %vm665_vm2, %v790_v32 }
 0x177   : > { %v767_v33 = vpop.f32.mrf.mxu2 }
 0x178   : > { %v768_v34 = vadd.f32 %v1102_v61, %v767_v33 }
 0x17a   : > { %v791_v35 = vmax.f32 %v768_v34, 0.0 }
 0x17c   : > { %1087 = vmatmul.msk.f32.gmra.mxu3 %vm665_vm2, %v791_v35 }
 0x17f   : > { %v770_v36 = vpop.f32.mrf.mxu2 }
 0x180   : > { %v771_v37 = vadd.f32 %v1102_v61, %v770_v36 }
 0x182   : > { %v792_v38 = vmax.f32 %v771_v37, 0.0 }
 0x184   : > { %1088 = vmatmul.msk.f32.gmra.mxu3 %vm665_vm2, %v792_v38 }
 0x187   : > { %v773_v40 = vpop.f32.mrf.mxu2 }
 0x188   : > { %v774_v41 = vadd.f32 %v1102_v61, %v773_v40 }
 0x18a   : > { %v793_v42 = vmax.f32 %v774_v41, 0.0 }
 0x18c   : > { %1089 = vmatmul.msk.f32.gmra.mxu3 %vm665_vm2, %v793_v42 }
 0x18f   : > { %v776_v43 = vpop.f32.mrf.mxu2 }
 0x190   : > { %v777_v44 = vadd.f32 %v1102_v61, %v776_v43 }
 0x192   : > { %v794_v45 = vmax.f32 %v777_v44, 0.0 }
 0x194   : > { %1090 = vmatmul.msk.f32.gmra.mxu3 %vm665_vm2, %v794_v45 }
 0x19f   : > { %v868_v47 = vpop.f32.mrf.mxu3 }
 0x1a0   : > { %v869_v48 = vadd.f32 %v1340_v46, %v868_v47 }
 0x1a2   : > { %v916_v49 = vmax.f32 %v869_v48, 0.0 }
 0x1a4   : > { %932 = vst.msk [vmem:[%s1347_s10] sm:$0xff] %vm507_vm1, %v916_v49 }
 0x1a7   : > { %v871_v50 = vpop.f32.mrf.mxu3 }
 0x1a8   : > { %v872_v51 = vadd.f32 %v1340_v46, %v871_v50 }
 0x1aa   : > { %v917_v52 = vmax.f32 %v872_v51, 0.0 }
 0x1ac   : > { %933 = vst.msk [vmem:[%s1347_s10 + $0x8] sm:$0xff] %vm507_vm1, %v917_v52 }
 0x1af   : > { %v874_v53 = vpop.f32.mrf.mxu3 }
 0x1b0   : > { %v875_v54 = vadd.f32 %v1340_v46, %v874_v53 }
 0x1b2   : > { %v918_v55 = vmax.f32 %v875_v54, 0.0 }
 0x1b4   : > { %934 = vst.msk [vmem:[%s1347_s10 + $0x10] sm:$0xff] %vm507_vm1, %v918_v55 }
 0x1b7   : > { %v877_v56 = vpop.f32.mrf.mxu3 }
 0x1b8   : > { %v878_v57 = vadd.f32 %v1340_v46, %v877_v56 }
 0x1ba   : > { %v919_v58 = vmax.f32 %v878_v57, 0.0 }
 0x1bc   : > { %935 = vst.msk [vmem:[%s1347_s10 + $0x18] sm:$0xff] %vm507_vm1, %v919_v58 }
 0x1bf   : > { %v880_v59 = vpop.f32.mrf.mxu3 }
 0x1c0   : > { %v881_v60 = vadd.f32 %v1340_v46, %v880_v59 }
 0x1c2   : > { %v920_v61 = vmax.f32 %v881_v60, 0.0 }
 0x1c4   : > { %936 = vst.msk [vmem:[%s1347_s10 + $0x20] sm:$0xff] %vm507_vm1, %v920_v61 }
 0x1c7   : > { %v883_v62 = vpop.f32.mrf.mxu3 }
 0x1c8   : > { %v884_v63 = vadd.f32 %v1340_v46, %v883_v62 }
 0x1ca   : > { %v921_v0 = vmax.f32 %v884_v63, 0.0 }
 0x1cc   : > { %937 = vst.msk [vmem:[%s1347_s10 + $0x28] sm:$0xff] %vm507_vm1, %v921_v0 }
 0x1cf   : > { %v886_v1 = vpop.f32.mrf.mxu3 }
 0x1d0   : > { %v887_v2 = vadd.f32 %v1340_v46, %v886_v1 }
 0x1d2   : > { %v922_v3 = vmax.f32 %v887_v2, 0.0 }
 0x1d4   : > { %938 = vst.msk [vmem:[%s1347_s10 + $0x30] sm:$0xff] %vm507_vm1, %v922_v3 }
 0x1d7   : > { %v889_v4 = vpop.f32.mrf.mxu3 }
 0x1d8   : > { %v890_v5 = vadd.f32 %v1340_v46, %v889_v4 }
 0x1da   : > { %v923_v39 = vmax.f32 %v890_v5, 0.0 }
 0x1dc   : > { %939 = vst.msk [vmem:[%s1347_s10 + $0x38] sm:$0xff] %vm507_vm1, %v923_v39 }
 0x1df   : > { %v892_v6 = vpop.f32.mrf.mxu3 }
 0x1e0   : > { %v893_v7 = vadd.f32 %v1340_v46, %v892_v6 }
 0x1e2   : > { %v924_v8 = vmax.f32 %v893_v7, 0.0 }
 0x1e4   : > { %940 = vst.msk [vmem:[%s1347_s10 + $0x40] sm:$0xff] %vm507_vm1, %v924_v8 }
 0x1e7   : > { %v895_v9 = vpop.f32.mrf.mxu3 }
 0x1e8   : > { %v896_v10 = vadd.f32 %v1340_v46, %v895_v9 }
 0x1ea   : > { %v925_v11 = vmax.f32 %v896_v10, 0.0 }
 0x1ec   : > { %941 = vst.msk [vmem:[%s1347_s10 + $0x48] sm:$0xff] %vm507_vm1, %v925_v11 }
 0x1ef   : > { %v898_v12 = vpop.f32.mrf.mxu3 }
 0x1f0   : > { %v899_v13 = vadd.f32 %v1340_v46, %v898_v12 }
 0x1f2   : > { %v926_v14 = vmax.f32 %v899_v13, 0.0 }
 0x1f4   : > { %942 = vst.msk [vmem:[%s1347_s10 + $0x50] sm:$0xff] %vm507_vm1, %v926_v14 }
 0x1f7   : > { %v901_v15 = vpop.f32.mrf.mxu3 }
 0x1f8   : > { %v902_v16 = vadd.f32 %v1340_v46, %v901_v15 }
 0x1fa   : > { %v927_v17 = vmax.f32 %v902_v16, 0.0 }
 0x1fc   : > { %943 = vst.msk [vmem:[%s1347_s10 + $0x58] sm:$0xff] %vm507_vm1, %v927_v17 }
 0x1ff   : > { %v904_v18 = vpop.f32.mrf.mxu3 }
 0x200   : > { %v905_v19 = vadd.f32 %v1340_v46, %v904_v18 }
 0x202   : > { %v928_v20 = vmax.f32 %v905_v19, 0.0 }
 0x204   : > { %944 = vst.msk [vmem:[%s1347_s10 + $0x60] sm:$0xff] %vm507_vm1, %v928_v20 }
 0x207   : > { %v907_v21 = vpop.f32.mrf.mxu3 }
 0x208   : > { %v908_v22 = vadd.f32 %v1340_v46, %v907_v21 }
 0x20a   : > { %v929_v23 = vmax.f32 %v908_v22, 0.0 }
 0x20c   : > { %945 = vst.msk [vmem:[%s1347_s10 + $0x68] sm:$0xff] %vm507_vm1, %v929_v23 }
 0x20f   : > { %v910_v24 = vpop.f32.mrf.mxu3 }
 0x210   : > { %v911_v25 = vadd.f32 %v1340_v46, %v910_v24 }
 0x212   : > { %v930_v26 = vmax.f32 %v911_v25, 0.0 }
 0x214   : > { %946 = vst.msk [vmem:[%s1347_s10 + $0x70] sm:$0xff] %vm507_vm1, %v930_v26 }
 0x217   : > { %v913_v27 = vpop.f32.mrf.mxu3 }
 0x218   : > { %v914_v28 = vadd.f32 %v1340_v46, %v913_v27 }
 0x21a   : > { %v931_v29 = vmax.f32 %v914_v28, 0.0 }
 0x21c   : > { %947 = vst.msk [vmem:[%s1347_s10 + $0x78] sm:$0xff] %vm507_vm1, %v931_v29 }
 0x21d PF: > { %s19_s30 = sadd.s32 1, %s1110_s30  }
 0x21e   : > { %p16_p4 = scmp.ge.s32.totalorder %s19_s30, 6  }
 0x220   :  { %18 = sbr.rel (!%p16_p4) target bundleno = 1 (0x1), region = 89 }

</bundles_post_ra>
